<compile_context>
chip_gen: v5e
topology: v5e:2x2
jax: 0.10.0
libtpu: 0.0.40
codegen_flags: <defaults>
</compile_context>

<pallas_src>
import math
from functools import partial

import jax
import jax.numpy as jnp
from jax.experimental import pallas as pl
from jax.experimental.pallas import tpu as pltpu


def _default_vmem_limit():
    """~75% of physical per-core VMEM (headroom for compiler scratch / buffers)."""
    try:
        cap = int(pltpu.get_tpu_info().vmem_capacity_bytes)
    except Exception:
        cap = 64 * 1024 * 1024          # conservative fallback (safe on v7x too)
    return (cap * 3) // 4


_VMEM_LIMIT_BYTES = _default_vmem_limit()


# ------------------------------ math helpers ------------------------------- #

def _gelu_tanh(x):
    # tanh-approximate GELU: transcendental goes to the EUP slot.  nn.GELU()
    # default is the exact erf form; the approximation error (<~1e-3) is far
    # below the bf16-matmul tolerance used below.
    c = math.sqrt(2.0 / math.pi)
    return 0.5 * x * (1.0 + jnp.tanh(c * (x + 0.044715 * x * x * x)))


def _layer_norm(h, w, b, eps):
    mean = jnp.mean(h, axis=-1, keepdims=True)
    var = jnp.mean(jnp.square(h - mean), axis=-1, keepdims=True)
    # rsqrt (EUP) + multiply instead of sqrt + divide (VALU).
    return (h - mean) * jax.lax.rsqrt(var + eps) * w + b


# ------------------------------ Pallas kernel ------------------------------ #

def _block_kernel(x_ref, wq_ref, bq_ref, wk_ref, bk_ref, wv_ref, bv_ref,
                  wo_ref, bo_ref, ln1w_ref, ln1b_ref,
                  w1_ref, w2_ref, ln2w_ref, ln2b_ref,
                  out_ref, attn_ref, acc_ref, *, scale, eps):
    """Whole transformer Block, fused.  Grid point = (batch b, head h).

    Per-head: Q/K/V projection, causal attention, ctx_h @ Wo_h accumulated
    into acc_ref.  Last head: bias + residual/LN1 + GELU FFN + residual/LN2.
    """
    h = pl.program_id(1)
    last_h = pl.num_programs(1) - 1

    x = x_ref[0]                                   # (S, D) f32, VMEM-resident
    xb = x.astype(jnp.bfloat16)

    # Per-head Q/K/V projections (bf16 operands, f32 accumulation, f32 bias).
    q = jnp.dot(xb, wq_ref[0], preferred_element_type=jnp.float32) + bq_ref[0]
    k = jnp.dot(xb, wk_ref[0], preferred_element_type=jnp.float32) + bk_ref[0]
    v = jnp.dot(xb, wv_ref[0], preferred_element_type=jnp.float32) + bv_ref[0]

    # logits = Q K^T * scale  (contract on the last dims; no explicit transpose).
    logits = jax.lax.dot_general(
        q.astype(jnp.bfloat16), k.astype(jnp.bfloat16),
        (((1,), (1,)), ((), ())),
        preferred_element_type=jnp.float32) * scale

    S = logits.shape[0]
    row = jax.lax.broadcasted_iota(jnp.int32, (S, S), 0)
    col = jax.lax.broadcasted_iota(jnp.int32, (S, S), 1)
    logits = jnp.where(col <= row, logits, jnp.float32(-1e20))

    # Numerically stable softmax in f32; reciprocal on the EUP.
    m = jnp.max(logits, axis=-1, keepdims=True)
    e = jnp.exp(logits - m)
    denom = jnp.sum(e, axis=-1, keepdims=True)
    p = e * pl.reciprocal(denom, approx=True)

    attn_ref[0, 0] = p.astype(attn_ref.dtype)

    # ctx_h = P @ V_h ; this head's slice of the output projection.
    ctx = jnp.dot(p.astype(jnp.bfloat16), v.astype(jnp.bfloat16),
                  preferred_element_type=jnp.float32)            # (S, hs)
    partial_out = jnp.dot(ctx.astype(jnp.bfloat16), wo_ref[0],
                          preferred_element_type=jnp.float32)    # (S, D)

    @pl.when(h == 0)
    def _():
        acc_ref[...] = jnp.zeros_like(acc_ref)

    acc_ref[...] += partial_out

    @pl.when(h == last_h)
    def _():
        attn_out = acc_ref[...] + bo_ref[...]
        a1 = _layer_norm(x + attn_out, ln1w_ref[...], ln1b_ref[...], eps)
        # FFN (no biases); dropout == identity (eval mode).
        hdn = jnp.dot(a1.astype(jnp.bfloat16), w1_ref[...],
                      preferred_element_type=jnp.float32)
        hdn = _gelu_tanh(hdn)
        ffn_out = jnp.dot(hdn.astype(jnp.bfloat16), w2_ref[...],
                          preferred_element_type=jnp.float32)
        a2 = _layer_norm(a1 + ffn_out, ln2w_ref[...], ln2b_ref[...], eps)
        out_ref[0] = a2.astype(out_ref.dtype)


# ------------------------------ Host wrappers ------------------------------ #

def _rep(shape):
    """BlockSpec for a grid-invariant (resident) operand."""
    return pl.BlockSpec(shape, lambda *_: (0,) * len(shape))


def block_forward(x, p, num_heads, eps=1e-5, attn_dtype=jnp.float32):
    B, S, D = x.shape
    H = num_heads
    assert D % H == 0
    hs = D // H
    d_ff = p["w1"].shape[1]
    scale = 1.0 / math.sqrt(hs)

    head_w = pl.BlockSpec((1, D, hs), lambda b, h: (h, 0, 0))   # per-head W_{Q,K,V}
    head_b = pl.BlockSpec((1, 1, hs), lambda b, h: (h, 0, 0))   # per-head biases
    head_wo = pl.BlockSpec((1, hs, D), lambda b, h: (h, 0, 0))  # per-head W_O rows

    out, attn = pl.pallas_call(
        partial(_block_kernel, scale=scale, eps=eps),
        out_shape=(jax.ShapeDtypeStruct((B, S, D), jnp.float32),
                   jax.ShapeDtypeStruct((B, H, S, S), attn_dtype)),
        grid=(B, H),
        in_specs=[pl.BlockSpec((1, S, D), lambda b, h: (b, 0, 0)),   # x
                  head_w, head_b,                                    # W_Q, b_Q
                  head_w, head_b,                                    # W_K, b_K
                  head_w, head_b,                                    # W_V, b_V
                  head_wo,                                           # W_O (head rows)
                  _rep((1, D)),                                      # b_O
                  _rep((1, D)), _rep((1, D)),                        # LN1 w, b
                  _rep((D, d_ff)), _rep((d_ff, D)),                  # FFN W1, W2
                  _rep((1, D)), _rep((1, D))],                       # LN2 w, b
        out_specs=(pl.BlockSpec((1, S, D), lambda b, h: (b, 0, 0)),  # block output
                   pl.BlockSpec((1, 1, S, S), lambda b, h: (b, h, 0, 0))),
        scratch_shapes=[pltpu.VMEM((S, D), jnp.float32)],            # attn_out acc
        compiler_params=pltpu.CompilerParams(
            dimension_semantics=("parallel", "arbitrary"),
            vmem_limit_bytes=_VMEM_LIMIT_BYTES),
    )(x, p["wq_h"], p["bq_h"], p["wk_h"], p["bk_h"], p["wv_h"], p["bv_h"],
      p["wo_h"], p["bo"], p["ln1_w"], p["ln1_b"], p["w1"], p["w2"],
      p["ln2_w"], p["ln2_b"])
    return out, attn


def decoder_forward(x, block_params, num_heads):
    """Mirrors Decoder.forward: returns (a, (hidden_states, attentions))."""
    a = x
    hidden_states = [a]
    attentions = []
    for p in block_params:
        a, layer_attn = block_forward(a, p, num_heads)
        hidden_states.append(a)
        attentions.append(layer_attn)
    hidden = jnp.stack(hidden_states, axis=1)      # (B, num_blocks+1, S, D)
    attns = jnp.stack(attentions, axis=1)          # (B, num_blocks, H, S, S)
    return a, (hidden, attns)


# -------------------------- Deterministic params --------------------------- #

def init_block_params(key, d_model, d_ff):
    """Reference (f32) parameters, weights stored as (in, out)."""
    ks = jax.random.split(key, 10)

    def lin(k, din, dout, scale=0.05):
        return jax.random.normal(k, (din, dout), jnp.float32) * scale

    return {
        "wq": lin(ks[0], d_model, d_model),
        "bq": lin(ks[1], 1, d_model),
        "wk": lin(ks[2], d_model, d_model),
        "bk": lin(ks[3], 1, d_model),
        "wv": lin(ks[4], d_model, d_model),
        "bv": lin(ks[5], 1, d_model),
        "wo": lin(ks[6], d_model, d_model),
        "bo": lin(ks[7], 1, d_model),
        "ln1_w": jnp.ones((1, d_model), jnp.float32),   # LayerNorm.reset_parameters
        "ln1_b": jnp.zeros((1, d_model), jnp.float32),
        "w1": lin(ks[8], d_model, d_ff),
        "w2": lin(ks[9], d_ff, d_model),
        "ln2_w": jnp.ones((1, d_model), jnp.float32),
        "ln2_b": jnp.zeros((1, d_model), jnp.float32),
    }


def pack_block_params(p, num_heads):
    """Kernel parameters: per-head weight layouts, matmul weights in bf16."""
    D = p["wq"].shape[0]
    H = num_heads
    hs = D // H

    def split_w(w):   # (D, D) -> (H, D, hs)
        return jnp.transpose(w.reshape(D, H, hs), (1, 0, 2)).astype(jnp.bfloat16)

    def split_b(b):   # (1, D) -> (H, 1, hs)
        return jnp.transpose(b.reshape(1, H, hs), (1, 0, 2))

    return {
        "wq_h": split_w(p["wq"]), "bq_h": split_b(p["bq"]),
        "wk_h": split_w(p["wk"]), "bk_h": split_b(p["bk"]),
        "wv_h": split_w(p["wv"]), "bv_h": split_b(p["bv"]),
        "wo_h": p["wo"].reshape(H, hs, D).astype(jnp.bfloat16),
        "bo": p["bo"],
        "ln1_w": p["ln1_w"], "ln1_b": p["ln1_b"],
        "w1": p["w1"].astype(jnp.bfloat16),
        "w2": p["w2"].astype(jnp.bfloat16),
        "ln2_w": p["ln2_w"], "ln2_b": p["ln2_b"],
    }


# --------------------------- Plain-JAX reference --------------------------- #

def _block_ref(x, p, num_heads, eps=1e-5):
    B, S, D = x.shape
    hs = D // num_heads
    q = x @ p["wq"] + p["bq"]
    k = x @ p["wk"] + p["bk"]
    v = x @ p["wv"] + p["bv"]

    def split(t):
        return t.reshape(B, S, num_heads, hs).transpose(0, 2, 1, 3)

    Q, K, V = split(q), split(k), split(v)
    logits = jnp.einsum("bhqd,bhkd->bhqk", Q, K) / math.sqrt(hs)
    mask = jnp.triu(jnp.ones((S, S), jnp.float32), k=1) * -1e20
    w = jax.nn.softmax(logits + mask, axis=-1)
    ctx = jnp.einsum("bhqk,bhkd->bhqd", w, V)
    merged = ctx.transpose(0, 2, 1, 3).reshape(B, S, D)
    attn_out = merged @ p["wo"] + p["bo"]
    a1 = _layer_norm(x + attn_out, p["ln1_w"], p["ln1_b"], eps)
    h = jax.nn.gelu(a1 @ p["w1"], approximate=False)     # exact erf, nn.GELU parity
    a2 = _layer_norm(a1 + h @ p["w2"], p["ln2_w"], p["ln2_b"], eps)
    return a2, w


def _decoder_ref(x, block_params, num_heads):
    a = x
    hs_list, attn_list = [a], []
    for p in block_params:
        a, w = _block_ref(a, p, num_heads)
        hs_list.append(a)
        attn_list.append(w)
    return a, (jnp.stack(hs_list, axis=1), jnp.stack(attn_list, axis=1))


# ---------------------------------- Main ----------------------------------- #

if __name__ == "__main__":
    # Small, forward-consistent shapes.
    B, S, d_model = 2, 8, 32
    num_heads, num_blocks, multiplier = 4, 2, 4
    d_ff = multiplier * d_model

    key = jax.random.PRNGKey(0)
    kx, kp = jax.random.split(key)
    x = jax.random.normal(kx, (B, S, d_model), jnp.float32)

    raw_params = [
        init_block_params(jax.random.fold_in(kp, i), d_model, d_ff)
        for i in range(num_blocks)
    ]
    kernel_params = [pack_block_params(p, num_heads) for p in raw_params]

    run = jax.jit(lambda xx, ps: decoder_forward(xx, ps, num_heads))
    out, (hidden_states, attentions) = run(x, kernel_params)
    out = jax.block_until_ready(out)
    hidden_states = jax.block_until_ready(hidden_states)
    attentions = jax.block_until_ready(attentions)

    assert out.shape == (B, S, d_model)
    assert hidden_states.shape == (B, num_blocks + 1, S, d_model)
    assert attentions.shape == (B, num_blocks, num_heads, S, S)

    # Sanity check against a plain-JAX f32 reference (tolerance covers the
    # bf16-operand / f32-accumulate MXU path, approx reciprocal, tanh GELU).
    ref_out, (ref_hidden, ref_attn) = _decoder_ref(x, raw_params, num_heads)
    assert jnp.allclose(out, ref_out, rtol=2e-2, atol=2e-2)
    assert jnp.allclose(hidden_states, ref_hidden, rtol=2e-2, atol=2e-2)
    assert jnp.allclose(attentions, ref_attn, rtol=2e-2, atol=2e-2)

    # TODO(synk): dropout (ffn_drop) is treated as identity (eval-mode semantics);
    # training-mode dropout is not implemented.
    print("KERNEL_OK")
</pallas_src>

<mosaic_0001>
module attributes {stable_mosaic.version = 11 : i64} {
  func.func @_block_kernel(%arg0: i32, %arg1: i32, %arg2: memref<1x8x32xf32, #tpu.memory_space<vmem>>, %arg3: memref<1x32x8xbf16, #tpu.memory_space<vmem>>, %arg4: memref<1x1x8xf32, #tpu.memory_space<vmem>>, %arg5: memref<1x32x8xbf16, #tpu.memory_space<vmem>>, %arg6: memref<1x1x8xf32, #tpu.memory_space<vmem>>, %arg7: memref<1x32x8xbf16, #tpu.memory_space<vmem>>, %arg8: memref<1x1x8xf32, #tpu.memory_space<vmem>>, %arg9: memref<1x8x32xbf16, #tpu.memory_space<vmem>>, %arg10: memref<1x32xf32, #tpu.memory_space<vmem>>, %arg11: memref<1x32xf32, #tpu.memory_space<vmem>>, %arg12: memref<1x32xf32, #tpu.memory_space<vmem>>, %arg13: memref<32x128xbf16, #tpu.memory_space<vmem>>, %arg14: memref<128x32xbf16, #tpu.memory_space<vmem>>, %arg15: memref<1x32xf32, #tpu.memory_space<vmem>>, %arg16: memref<1x32xf32, #tpu.memory_space<vmem>>, %arg17: memref<1x8x32xf32, #tpu.memory_space<vmem>>, %arg18: memref<1x1x8x8xf32, #tpu.memory_space<vmem>>, %arg19: memref<8x32xf32, #tpu.memory_space<vmem>>) attributes {dimension_semantics = [#tpu.dimension_semantics<parallel>, #tpu.dimension_semantics<arbitrary>], iteration_bounds = array<i64: 2, 4>, scalar_prefetch = 0 : i64, scratch_operands = 1 : i64, tpu.core_type = #tpu.core_type<tc>, window_params = [{transform_indices = @transform_0, window_bounds = array<i64: 1, 8, 32>}, {transform_indices = @transform_1, window_bounds = array<i64: 1, 32, 8>}, {transform_indices = @transform_2, window_bounds = array<i64: 1, 1, 8>}, {transform_indices = @transform_3, window_bounds = array<i64: 1, 32, 8>}, {transform_indices = @transform_4, window_bounds = array<i64: 1, 1, 8>}, {transform_indices = @transform_5, window_bounds = array<i64: 1, 32, 8>}, {transform_indices = @transform_6, window_bounds = array<i64: 1, 1, 8>}, {transform_indices = @transform_7, window_bounds = array<i64: 1, 8, 32>}, {pipeline_mode = #tpu.pipeline_mode<synchronous>, transform_indices = @transform_8, window_bounds = array<i64: 1, 32>}, {pipeline_mode = #tpu.pipeline_mode<synchronous>, transform_indices = @transform_9, window_bounds = array<i64: 1, 32>}, {pipeline_mode = #tpu.pipeline_mode<synchronous>, transform_indices = @transform_10, window_bounds = array<i64: 1, 32>}, {pipeline_mode = #tpu.pipeline_mode<synchronous>, transform_indices = @transform_11, window_bounds = array<i64: 32, 128>}, {pipeline_mode = #tpu.pipeline_mode<synchronous>, transform_indices = @transform_12, window_bounds = array<i64: 128, 32>}, {pipeline_mode = #tpu.pipeline_mode<synchronous>, transform_indices = @transform_13, window_bounds = array<i64: 1, 32>}, {pipeline_mode = #tpu.pipeline_mode<synchronous>, transform_indices = @transform_14, window_bounds = array<i64: 1, 32>}, {transform_indices = @transform_15, window_bounds = array<i64: 1, 8, 32>}, {transform_indices = @transform_16, window_bounds = array<i64: 1, 1, 8, 8>}]} {
    %c0 = arith.constant 0 : index
    %c0_0 = arith.constant 0 : index
    %c0_1 = arith.constant 0 : index
    %0 = vector.load %arg2[%c0, %c0_0, %c0_1] : memref<1x8x32xf32, #tpu.memory_space<vmem>>, vector<1x8x32xf32>
    %1 = vector.shape_cast %0 : vector<1x8x32xf32> to vector<8x32xf32>
    %2 = arith.truncf %1 : vector<8x32xf32> to vector<8x32xbf16>
    %c0_2 = arith.constant 0 : index
    %c0_3 = arith.constant 0 : index
    %c0_4 = arith.constant 0 : index
    %3 = vector.load %arg3[%c0_2, %c0_3, %c0_4] : memref<1x32x8xbf16, #tpu.memory_space<vmem>>, vector<1x32x8xbf16>
    %4 = vector.shape_cast %3 : vector<1x32x8xbf16> to vector<32x8xbf16>
    %cst = arith.constant dense<0.000000e+00> : vector<8x8xf32>
    %5 = tpu.matmul %2, %4, %cst {dimension_numbers = #tpu.dot_dimension_numbers<[1], [0], [0], [1], [0, 0, 1, 1], [], []>} : vector<8x32xbf16>, vector<32x8xbf16>, vector<8x8xf32> -> vector<8x8xf32>
    %c0_5 = arith.constant 0 : index
    %c0_6 = arith.constant 0 : index
    %c0_7 = arith.constant 0 : index
    %6 = vector.load %arg4[%c0_5, %c0_6, %c0_7] : memref<1x1x8xf32, #tpu.memory_space<vmem>>, vector<1x1x8xf32>
    %7 = vector.shape_cast %6 : vector<1x1x8xf32> to vector<1x8xf32>
    %8 = vector.broadcast %7 : vector<1x8xf32> to vector<8x8xf32>
    %9 = arith.addf %5, %8 : vector<8x8xf32>
    %c0_8 = arith.constant 0 : index
    %c0_9 = arith.constant 0 : index
    %c0_10 = arith.constant 0 : index
    %10 = vector.load %arg5[%c0_8, %c0_9, %c0_10] : memref<1x32x8xbf16, #tpu.memory_space<vmem>>, vector<1x32x8xbf16>
    %11 = vector.shape_cast %10 : vector<1x32x8xbf16> to vector<32x8xbf16>
    %cst_11 = arith.constant dense<0.000000e+00> : vector<8x8xf32>
    %12 = tpu.matmul %2, %11, %cst_11 {dimension_numbers = #tpu.dot_dimension_numbers<[1], [0], [0], [1], [0, 0, 1, 1], [], []>} : vector<8x32xbf16>, vector<32x8xbf16>, vector<8x8xf32> -> vector<8x8xf32>
    %c0_12 = arith.constant 0 : index
    %c0_13 = arith.constant 0 : index
    %c0_14 = arith.constant 0 : index
    %13 = vector.load %arg6[%c0_12, %c0_13, %c0_14] : memref<1x1x8xf32, #tpu.memory_space<vmem>>, vector<1x1x8xf32>
    %14 = vector.shape_cast %13 : vector<1x1x8xf32> to vector<1x8xf32>
    %15 = vector.broadcast %14 : vector<1x8xf32> to vector<8x8xf32>
    %16 = arith.addf %12, %15 : vector<8x8xf32>
    %c0_15 = arith.constant 0 : index
    %c0_16 = arith.constant 0 : index
    %c0_17 = arith.constant 0 : index
    %17 = vector.load %arg7[%c0_15, %c0_16, %c0_17] : memref<1x32x8xbf16, #tpu.memory_space<vmem>>, vector<1x32x8xbf16>
    %18 = vector.shape_cast %17 : vector<1x32x8xbf16> to vector<32x8xbf16>
    %cst_18 = arith.constant dense<0.000000e+00> : vector<8x8xf32>
    %19 = tpu.matmul %2, %18, %cst_18 {dimension_numbers = #tpu.dot_dimension_numbers<[1], [0], [0], [1], [0, 0, 1, 1], [], []>} : vector<8x32xbf16>, vector<32x8xbf16>, vector<8x8xf32> -> vector<8x8xf32>
    %c0_19 = arith.constant 0 : index
    %c0_20 = arith.constant 0 : index
    %c0_21 = arith.constant 0 : index
    %20 = vector.load %arg8[%c0_19, %c0_20, %c0_21] : memref<1x1x8xf32, #tpu.memory_space<vmem>>, vector<1x1x8xf32>
    %21 = vector.shape_cast %20 : vector<1x1x8xf32> to vector<1x8xf32>
    %22 = vector.broadcast %21 : vector<1x8xf32> to vector<8x8xf32>
    %23 = arith.addf %19, %22 : vector<8x8xf32>
    %24 = arith.truncf %9 : vector<8x8xf32> to vector<8x8xbf16>
    %25 = arith.truncf %16 : vector<8x8xf32> to vector<8x8xbf16>
    %cst_22 = arith.constant dense<0.000000e+00> : vector<8x8xf32>
    %26 = tpu.matmul %24, %25, %cst_22 {dimension_numbers = #tpu.dot_dimension_numbers<[1], [1], [0], [0], [0, 0, 1, 0], [], []>} : vector<8x8xbf16>, vector<8x8xbf16>, vector<8x8xf32> -> vector<8x8xf32>
    %cst_23 = arith.constant 0.353553385 : f32
    %27 = vector.broadcast %cst_23 : f32 to vector<8x8xf32>
    %28 = arith.mulf %26, %27 : vector<8x8xf32>
    %29 = tpu.iota {dimensions = array<i32: 0>} : vector<8x8xi32>
    %30 = tpu.iota {dimensions = array<i32: 1>} : vector<8x8xi32>
    %31 = arith.cmpi sle, %30, %29 : vector<8x8xi32>
    %cst_24 = arith.constant -1.000000e+20 : f32
    %32 = vector.broadcast %cst_24 : f32 to vector<8x8xf32>
    %33 = arith.select %31, %28, %32 : vector<8x8xi1>, vector<8x8xf32>
    %cst_25 = arith.constant dense<0xFF800000> : vector<8xf32>
    %34 = vector.multi_reduction <maximumf>, %33, %cst_25 [1] : vector<8x8xf32> to vector<8xf32>
    %35 = vector.shape_cast %34 : vector<8xf32> to vector<8x1xf32>
    %36 = vector.broadcast %35 : vector<8x1xf32> to vector<8x8xf32>
    %37 = arith.subf %33, %36 : vector<8x8xf32>
    %38 = math.exp %37 : vector<8x8xf32>
    %cst_26 = arith.constant dense<0.000000e+00> : vector<8xf32>
    %39 = vector.multi_reduction <add>, %38, %cst_26 [1] : vector<8x8xf32> to vector<8xf32>
    %40 = vector.shape_cast %39 : vector<8xf32> to vector<8x1xf32>
    %41 = tpu.reciprocal %40 {approx = true} : vector<8x1xf32> -> vector<8x1xf32>
    %42 = vector.broadcast %41 : vector<8x1xf32> to vector<8x8xf32>
    %43 = arith.mulf %38, %42 : vector<8x8xf32>
    %c0_27 = arith.constant 0 : index
    %c0_28 = arith.constant 0 : index
    %c0_29 = arith.constant 0 : index
    %c0_30 = arith.constant 0 : index
    %44 = vector.load %arg18[%c0_27, %c0_28, %c0_29, %c0_30] : memref<1x1x8x8xf32, #tpu.memory_space<vmem>>, vector<1x1x8x8xf32>
    %45 = vector.shape_cast %44 : vector<1x1x8x8xf32> to vector<8x8xf32>
    %46 = vector.shape_cast %43 : vector<8x8xf32> to vector<1x1x8x8xf32>
    tpu.vector_store %arg18[%c0_27, %c0_28, %c0_29, %c0_30], %46 {strides = array<i32>} : memref<1x1x8x8xf32, #tpu.memory_space<vmem>>, vector<1x1x8x8xf32>,
    %47 = arith.truncf %43 : vector<8x8xf32> to vector<8x8xbf16>
    %48 = arith.truncf %23 : vector<8x8xf32> to vector<8x8xbf16>
    %cst_31 = arith.constant dense<0.000000e+00> : vector<8x8xf32>
    %49 = tpu.matmul %47, %48, %cst_31 {dimension_numbers = #tpu.dot_dimension_numbers<[1], [0], [0], [1], [0, 0, 1, 1], [], []>} : vector<8x8xbf16>, vector<8x8xbf16>, vector<8x8xf32> -> vector<8x8xf32>
    %50 = arith.truncf %49 : vector<8x8xf32> to vector<8x8xbf16>
    %c0_32 = arith.constant 0 : index
    %c0_33 = arith.constant 0 : index
    %c0_34 = arith.constant 0 : index
    %51 = vector.load %arg9[%c0_32, %c0_33, %c0_34] : memref<1x8x32xbf16, #tpu.memory_space<vmem>>, vector<1x8x32xbf16>
    %52 = vector.shape_cast %51 : vector<1x8x32xbf16> to vector<8x32xbf16>
    %cst_35 = arith.constant dense<0.000000e+00> : vector<8x32xf32>
    %53 = tpu.matmul %50, %52, %cst_35 {dimension_numbers = #tpu.dot_dimension_numbers<[1], [0], [0], [1], [0, 0, 1, 1], [], []>} : vector<8x8xbf16>, vector<8x32xbf16>, vector<8x32xf32> -> vector<8x32xf32>
    %c0_i32 = arith.constant 0 : i32
    %54 = arith.cmpi eq, %arg1, %c0_i32 : i32
    %55 = arith.extui %54 : i1 to i32
    %c0_i32_36 = arith.constant 0 : i32
    %56 = arith.cmpi ne, %55, %c0_i32_36 : i32
    scf.if %56 {
      %cst_42 = arith.constant 0.000000e+00 : f32
      %63 = vector.broadcast %cst_42 : f32 to vector<8x32xf32>
      %c0_43 = arith.constant 0 : index
      %c0_44 = arith.constant 0 : index
      %64 = vector.load %arg19[%c0_43, %c0_44] : memref<8x32xf32, #tpu.memory_space<vmem>>, vector<8x32xf32>
      tpu.vector_store %arg19[%c0_43, %c0_44], %63 {strides = array<i32>} : memref<8x32xf32, #tpu.memory_space<vmem>>, vector<8x32xf32>,
    } else {
    }
    %c0_37 = arith.constant 0 : index
    %c0_38 = arith.constant 0 : index
    %57 = vector.load %arg19[%c0_37, %c0_38] : memref<8x32xf32, #tpu.memory_space<vmem>>, vector<8x32xf32>
    %58 = arith.addf %57, %53 : vector<8x32xf32>
    %c0_39 = arith.constant 0 : index
    %c0_40 = arith.constant 0 : index
    %59 = vector.load %arg19[%c0_39, %c0_40] : memref<8x32xf32, #tpu.memory_space<vmem>>, vector<8x32xf32>
    tpu.vector_store %arg19[%c0_39, %c0_40], %58 {strides = array<i32>} : memref<8x32xf32, #tpu.memory_space<vmem>>, vector<8x32xf32>,
    %c3_i32 = arith.constant 3 : i32
    %60 = arith.cmpi eq, %arg1, %c3_i32 : i32
    %61 = arith.extui %60 : i1 to i32
    %c0_i32_41 = arith.constant 0 : i32
    %62 = arith.cmpi ne, %61, %c0_i32_41 : i32
    scf.if %62 {
      %c0_42 = arith.constant 0 : index
      %c0_43 = arith.constant 0 : index
      %63 = vector.load %arg19[%c0_42, %c0_43] : memref<8x32xf32, #tpu.memory_space<vmem>>, vector<8x32xf32>
      %c0_44 = arith.constant 0 : index
      %c0_45 = arith.constant 0 : index
      %64 = vector.load %arg10[%c0_44, %c0_45] : memref<1x32xf32, #tpu.memory_space<vmem>>, vector<1x32xf32>
      %65 = vector.broadcast %64 : vector<1x32xf32> to vector<8x32xf32>
      %66 = arith.addf %63, %65 : vector<8x32xf32>
      %67 = arith.addf %1, %66 : vector<8x32xf32>
      %c0_46 = arith.constant 0 : index
      %c0_47 = arith.constant 0 : index
      %68 = vector.load %arg11[%c0_46, %c0_47] : memref<1x32xf32, #tpu.memory_space<vmem>>, vector<1x32xf32>
      %c0_48 = arith.constant 0 : index
      %c0_49 = arith.constant 0 : index
      %69 = vector.load %arg12[%c0_48, %c0_49] : memref<1x32xf32, #tpu.memory_space<vmem>>, vector<1x32xf32>
      %cst_50 = arith.constant dense<0.000000e+00> : vector<8xf32>
      %70 = vector.multi_reduction <add>, %67, %cst_50 [1] : vector<8x32xf32> to vector<8xf32>
      %71 = vector.shape_cast %70 : vector<8xf32> to vector<8x1xf32>
      %cst_51 = arith.constant 3.200000e+01 : f32
      %72 = vector.broadcast %cst_51 : f32 to vector<8x1xf32>
      %73 = arith.divf %71, %72 : vector<8x1xf32>
      %74 = vector.broadcast %73 : vector<8x1xf32> to vector<8x32xf32>
      %75 = arith.subf %67, %74 : vector<8x32xf32>
      %76 = arith.mulf %75, %75 : vector<8x32xf32>
      %cst_52 = arith.constant dense<0.000000e+00> : vector<8xf32>
      %77 = vector.multi_reduction <add>, %76, %cst_52 [1] : vector<8x32xf32> to vector<8xf32>
      %78 = vector.shape_cast %77 : vector<8xf32> to vector<8x1xf32>
      %cst_53 = arith.constant 3.200000e+01 : f32
      %79 = vector.broadcast %cst_53 : f32 to vector<8x1xf32>
      %80 = arith.divf %78, %79 : vector<8x1xf32>
      %81 = vector.broadcast %73 : vector<8x1xf32> to vector<8x32xf32>
      %82 = arith.subf %67, %81 : vector<8x32xf32>
      %cst_54 = arith.constant 9.99999974E-6 : f32
      %83 = vector.broadcast %cst_54 : f32 to vector<8x1xf32>
      %84 = arith.addf %80, %83 : vector<8x1xf32>
      %85 = math.rsqrt %84 : vector<8x1xf32>
      %86 = vector.broadcast %85 : vector<8x1xf32> to vector<8x32xf32>
      %87 = arith.mulf %82, %86 : vector<8x32xf32>
      %88 = vector.broadcast %68 : vector<1x32xf32> to vector<8x32xf32>
      %89 = arith.mulf %87, %88 : vector<8x32xf32>
      %90 = vector.broadcast %69 : vector<1x32xf32> to vector<8x32xf32>
      %91 = arith.addf %89, %90 : vector<8x32xf32>
      %92 = arith.truncf %91 : vector<8x32xf32> to vector<8x32xbf16>
      %c0_55 = arith.constant 0 : index
      %c0_56 = arith.constant 0 : index
      %93 = vector.load %arg13[%c0_55, %c0_56] : memref<32x128xbf16, #tpu.memory_space<vmem>>, vector<32x128xbf16>
      %cst_57 = arith.constant dense<0.000000e+00> : vector<8x128xf32>
      %94 = tpu.matmul %92, %93, %cst_57 {dimension_numbers = #tpu.dot_dimension_numbers<[1], [0], [0], [1], [0, 0, 1, 1], [], []>} : vector<8x32xbf16>, vector<32x128xbf16>, vector<8x128xf32> -> vector<8x128xf32>
      %cst_58 = arith.constant 5.000000e-01 : f32
      %95 = vector.broadcast %cst_58 : f32 to vector<8x128xf32>
      %96 = arith.mulf %95, %94 : vector<8x128xf32>
      %cst_59 = arith.constant 4.471500e-02 : f32
      %97 = vector.broadcast %cst_59 : f32 to vector<8x128xf32>
      %98 = arith.mulf %97, %94 : vector<8x128xf32>
      %99 = arith.mulf %98, %94 : vector<8x128xf32>
      %100 = arith.mulf %99, %94 : vector<8x128xf32>
      %101 = arith.addf %94, %100 : vector<8x128xf32>
      %cst_60 = arith.constant 0.797884583 : f32
      %102 = vector.broadcast %cst_60 : f32 to vector<8x128xf32>
      %103 = arith.mulf %102, %101 : vector<8x128xf32>
      %104 = math.tanh %103 : vector<8x128xf32>
      %cst_61 = arith.constant 1.000000e+00 : f32
      %105 = vector.broadcast %cst_61 : f32 to vector<8x128xf32>
      %106 = arith.addf %105, %104 : vector<8x128xf32>
      %107 = arith.mulf %96, %106 : vector<8x128xf32>
      %108 = arith.truncf %107 : vector<8x128xf32> to vector<8x128xbf16>
      %c0_62 = arith.constant 0 : index
      %c0_63 = arith.constant 0 : index
      %109 = vector.load %arg14[%c0_62, %c0_63] : memref<128x32xbf16, #tpu.memory_space<vmem>>, vector<128x32xbf16>
      %cst_64 = arith.constant dense<0.000000e+00> : vector<8x32xf32>
      %110 = tpu.matmul %108, %109, %cst_64 {dimension_numbers = #tpu.dot_dimension_numbers<[1], [0], [0], [1], [0, 0, 1, 1], [], []>} : vector<8x128xbf16>, vector<128x32xbf16>, vector<8x32xf32> -> vector<8x32xf32>
      %111 = arith.addf %91, %110 : vector<8x32xf32>
      %c0_65 = arith.constant 0 : index
      %c0_66 = arith.constant 0 : index
      %112 = vector.load %arg15[%c0_65, %c0_66] : memref<1x32xf32, #tpu.memory_space<vmem>>, vector<1x32xf32>
      %c0_67 = arith.constant 0 : index
      %c0_68 = arith.constant 0 : index
      %113 = vector.load %arg16[%c0_67, %c0_68] : memref<1x32xf32, #tpu.memory_space<vmem>>, vector<1x32xf32>
      %cst_69 = arith.constant dense<0.000000e+00> : vector<8xf32>
      %114 = vector.multi_reduction <add>, %111, %cst_69 [1] : vector<8x32xf32> to vector<8xf32>
      %115 = vector.shape_cast %114 : vector<8xf32> to vector<8x1xf32>
      %cst_70 = arith.constant 3.200000e+01 : f32
      %116 = vector.broadcast %cst_70 : f32 to vector<8x1xf32>
      %117 = arith.divf %115, %116 : vector<8x1xf32>
      %118 = vector.broadcast %117 : vector<8x1xf32> to vector<8x32xf32>
      %119 = arith.subf %111, %118 : vector<8x32xf32>
      %120 = arith.mulf %119, %119 : vector<8x32xf32>
      %cst_71 = arith.constant dense<0.000000e+00> : vector<8xf32>
      %121 = vector.multi_reduction <add>, %120, %cst_71 [1] : vector<8x32xf32> to vector<8xf32>
      %122 = vector.shape_cast %121 : vector<8xf32> to vector<8x1xf32>
      %cst_72 = arith.constant 3.200000e+01 : f32
      %123 = vector.broadcast %cst_72 : f32 to vector<8x1xf32>
      %124 = arith.divf %122, %123 : vector<8x1xf32>
      %125 = vector.broadcast %117 : vector<8x1xf32> to vector<8x32xf32>
      %126 = arith.subf %111, %125 : vector<8x32xf32>
      %cst_73 = arith.constant 9.99999974E-6 : f32
      %127 = vector.broadcast %cst_73 : f32 to vector<8x1xf32>
      %128 = arith.addf %124, %127 : vector<8x1xf32>
      %129 = math.rsqrt %128 : vector<8x1xf32>
      %130 = vector.broadcast %129 : vector<8x1xf32> to vector<8x32xf32>
      %131 = arith.mulf %126, %130 : vector<8x32xf32>
      %132 = vector.broadcast %112 : vector<1x32xf32> to vector<8x32xf32>
      %133 = arith.mulf %131, %132 : vector<8x32xf32>
      %134 = vector.broadcast %113 : vector<1x32xf32> to vector<8x32xf32>
      %135 = arith.addf %133, %134 : vector<8x32xf32>
      %c0_74 = arith.constant 0 : index
      %c0_75 = arith.constant 0 : index
      %c0_76 = arith.constant 0 : index
      %136 = vector.load %arg17[%c0_74, %c0_75, %c0_76] : memref<1x8x32xf32, #tpu.memory_space<vmem>>, vector<1x8x32xf32>
      %137 = vector.shape_cast %136 : vector<1x8x32xf32> to vector<8x32xf32>
      %138 = vector.shape_cast %135 : vector<8x32xf32> to vector<1x8x32xf32>
      tpu.vector_store %arg17[%c0_74, %c0_75, %c0_76], %138 {strides = array<i32>} : memref<1x8x32xf32, #tpu.memory_space<vmem>>, vector<1x8x32xf32>,
    } else {
    }
    return
  }
  func.func @transform_0(%arg0: i32, %arg1: i32) -> (i32, i32, i32) {
    %c0_i32 = arith.constant 0 : i32
    %c0_i32_0 = arith.constant 0 : i32
    %c0_i32_1 = arith.constant 0 : i32
    return %arg0, %c0_i32, %c0_i32_0 : i32, i32, i32
  }
  func.func @transform_1(%arg0: i32, %arg1: i32) -> (i32, i32, i32) {
    %c0_i32 = arith.constant 0 : i32
    %c0_i32_0 = arith.constant 0 : i32
    %c0_i32_1 = arith.constant 0 : i32
    return %arg1, %c0_i32, %c0_i32_0 : i32, i32, i32
  }
  func.func @transform_2(%arg0: i32, %arg1: i32) -> (i32, i32, i32) {
    %c0_i32 = arith.constant 0 : i32
    %c0_i32_0 = arith.constant 0 : i32
    %c0_i32_1 = arith.constant 0 : i32
    return %arg1, %c0_i32, %c0_i32_0 : i32, i32, i32
  }
  func.func @transform_3(%arg0: i32, %arg1: i32) -> (i32, i32, i32) {
    %c0_i32 = arith.constant 0 : i32
    %c0_i32_0 = arith.constant 0 : i32
    %c0_i32_1 = arith.constant 0 : i32
    return %arg1, %c0_i32, %c0_i32_0 : i32, i32, i32
  }
  func.func @transform_4(%arg0: i32, %arg1: i32) -> (i32, i32, i32) {
    %c0_i32 = arith.constant 0 : i32
    %c0_i32_0 = arith.constant 0 : i32
    %c0_i32_1 = arith.constant 0 : i32
    return %arg1, %c0_i32, %c0_i32_0 : i32, i32, i32
  }
  func.func @transform_5(%arg0: i32, %arg1: i32) -> (i32, i32, i32) {
    %c0_i32 = arith.constant 0 : i32
    %c0_i32_0 = arith.constant 0 : i32
    %c0_i32_1 = arith.constant 0 : i32
    return %arg1, %c0_i32, %c0_i32_0 : i32, i32, i32
  }
  func.func @transform_6(%arg0: i32, %arg1: i32) -> (i32, i32, i32) {
    %c0_i32 = arith.constant 0 : i32
    %c0_i32_0 = arith.constant 0 : i32
    %c0_i32_1 = arith.constant 0 : i32
    return %arg1, %c0_i32, %c0_i32_0 : i32, i32, i32
  }
  func.func @transform_7(%arg0: i32, %arg1: i32) -> (i32, i32, i32) {
    %c0_i32 = arith.constant 0 : i32
    %c0_i32_0 = arith.constant 0 : i32
    %c0_i32_1 = arith.constant 0 : i32
    return %arg1, %c0_i32, %c0_i32_0 : i32, i32, i32
  }
  func.func @transform_8(%arg0: i32, %arg1: i32) -> (i32, i32) {
    %c0_i32 = arith.constant 0 : i32
    %c0_i32_0 = arith.constant 0 : i32
    %c0_i32_1 = arith.constant 0 : i32
    return %c0_i32, %c0_i32_0 : i32, i32
  }
  func.func @transform_9(%arg0: i32, %arg1: i32) -> (i32, i32) {
    %c0_i32 = arith.constant 0 : i32
    %c0_i32_0 = arith.constant 0 : i32
    %c0_i32_1 = arith.constant 0 : i32
    return %c0_i32, %c0_i32_0 : i32, i32
  }
  func.func @transform_10(%arg0: i32, %arg1: i32) -> (i32, i32) {
    %c0_i32 = arith.constant 0 : i32
    %c0_i32_0 = arith.constant 0 : i32
    %c0_i32_1 = arith.constant 0 : i32
    return %c0_i32, %c0_i32_0 : i32, i32
  }
  func.func @transform_11(%arg0: i32, %arg1: i32) -> (i32, i32) {
    %c0_i32 = arith.constant 0 : i32
    %c0_i32_0 = arith.constant 0 : i32
    %c0_i32_1 = arith.constant 0 : i32
    return %c0_i32, %c0_i32_0 : i32, i32
  }
  func.func @transform_12(%arg0: i32, %arg1: i32) -> (i32, i32) {
    %c0_i32 = arith.constant 0 : i32
    %c0_i32_0 = arith.constant 0 : i32
    %c0_i32_1 = arith.constant 0 : i32
    return %c0_i32, %c0_i32_0 : i32, i32
  }
  func.func @transform_13(%arg0: i32, %arg1: i32) -> (i32, i32) {
    %c0_i32 = arith.constant 0 : i32
    %c0_i32_0 = arith.constant 0 : i32
    %c0_i32_1 = arith.constant 0 : i32
    return %c0_i32, %c0_i32_0 : i32, i32
  }
  func.func @transform_14(%arg0: i32, %arg1: i32) -> (i32, i32) {
    %c0_i32 = arith.constant 0 : i32
    %c0_i32_0 = arith.constant 0 : i32
    %c0_i32_1 = arith.constant 0 : i32
    return %c0_i32, %c0_i32_0 : i32, i32
  }
  func.func @transform_15(%arg0: i32, %arg1: i32) -> (i32, i32, i32) {
    %c0_i32 = arith.constant 0 : i32
    %c0_i32_0 = arith.constant 0 : i32
    %c0_i32_1 = arith.constant 0 : i32
    return %arg0, %c0_i32, %c0_i32_0 : i32, i32, i32
  }
  func.func @transform_16(%arg0: i32, %arg1: i32) -> (i32, i32, i32, i32) {
    %c0_i32 = arith.constant 0 : i32
    %c0_i32_0 = arith.constant 0 : i32
    %c0_i32_1 = arith.constant 0 : i32
    return %arg0, %arg1, %c0_i32, %c0_i32_0 : i32, i32, i32, i32
  }
}

</mosaic_0001>

<bundles_post_ra>
// kernel: _lambda_.2
= control target key start
LH: loop header
LB: loop body
LE: loop exit
PB: predicated region body
PF: predicated region fallthrough
CT: control target
= control target key end

     0   :  { %s1556_s21 = smov 0   ;;  %s1558_s22 = smov 0   ;;  %s1731_s0 = inlined_call_operand.vmem [shape: f32[2,8,32], index: 0, kind: input, shape index: {}]   ;;  %s1732_s1 = inlined_call_operand.vmem [shape: bf16[4,32,8], index: 1, kind: input, shape index: {}]   ;;  %s1733_s2 = inlined_call_operand.vmem [shape: f32[4,1,8], index: 2, kind: input, shape index: {}]   ;;  %s1734_s3 = inlined_call_operand.vmem [shape: bf16[4,32,8], index: 3, kind: input, shape index: {}]   ;;  %s1735_s4 = inlined_call_operand.vmem [shape: f32[4,1,8], index: 4, kind: input, shape index: {}]   ;;  %s1736_s5 = inlined_call_operand.vmem [shape: bf16[4,32,8], index: 5, kind: input, shape index: {}]   ;;  %s1737_s6 = inlined_call_operand.vmem [shape: f32[4,1,8], index: 6, kind: input, shape index: {}]   ;;  %s1738_s7 = inlined_call_operand.vmem [shape: bf16[4,8,32], index: 7, kind: input, shape index: {}]   ;;  %s1739_s8 = inlined_call_operand.vmem [shape: f32[1,32], index: 8, kind: input, shape index: {}]   ;;  %s1740_s9 = inlined_call_operand.vmem [shape: f32[1,32], index: 9, kind: input, shape index: {}]   ;;  %s1741_s10 = inlined_call_operand.vmem [shape: f32[1,32], index: 10, kind: input, shape index: {}]   ;;  %s1742_s11 = inlined_call_operand.vmem [shape: bf16[32,128], index: 11, kind: input, shape index: {}]   ;;  %s1743_s12 = inlined_call_operand.vmem [shape: bf16[128,32], index: 12, kind: input, shape index: {}]   ;;  %s1744_s13 = inlined_call_operand.vmem [shape: f32[1,32], index: 13, kind: input, shape index: {}]   ;;  %s1745_s14 = inlined_call_operand.vmem [shape: f32[1,32], index: 14, kind: input, shape index: {}]   ;;  %s1746_s15 = inlined_call_operand.vmem [shape: f32[2,8,32], index: 15, kind: output, shape index: {0}]   ;;  %s1747_s16 = inlined_call_operand.vmem [shape: f32[2,4,8,8], index: 16, kind: output, shape index: {1}]  }
   0x1   :  { %1751 = sst [smem:[#allocation8_spill]] %s1731_s0  ;;  %s1560_s23 = smov 0  }
   0x2   :  { %1752 = sst [smem:[#allocation9_spill]] %s1740_s9  ;;  %s1562_s24 = smov 0  }
   0x3   :  { %1753 = sst [smem:[#allocation10_spill]] %s1741_s10  ;;  %s1564_s25 = smov 0  }
   0x4   :  { %1754 = sst [smem:[#allocation11_spill]] %s1744_s13 }
   0x5   :  { %1755 = sst [smem:[#allocation12_spill]] %s1745_s14 }
   0x6 LB: > { %1756 = sst [smem:[#allocation3_spill]] %s1459_s23  ;;  %s36_s26 = sadd.s32 1, %s1459_s23  ;;  %s1467_s25 = sphi %s1564_s25, %s27_s25   ;;  %s1463_s24 = sphi %s1562_s24, %s1770_s24   ;;  %s1459_s23 = sphi %s1560_s23, %s1769_s23   ;;  %s1455_s22 = sphi %s1558_s22, %s1768_s22   ;;  %s1451_s21 = sphi %s1556_s21, %s1767_s21  }
   0x7   : > { %1757 = sst [smem:[#allocation4_spill]] %s1463_s24  ;;  %s39_s27 = sadd.s32 1, %s1463_s24 }
   0x8   : > { %1758 = sst [smem:[#allocation5_spill]] %s1467_s25  ;;  %p37_p0 = scmp.ge.s32.totalorder %s36_s26, 4 }
   0x9   : > { %p1261_p1 = scmp.ge.s32.totalorder %s1467_s25, 1  ;;  %p541_p2 = scmp.lt.s32.totalorder %s1467_s25, 9 }
   0xa   : > { %s1772_s26 = smov (%p37_p0, %s36_s26), 0  ;;  %s1774_s27 = smov (!%p37_p0, %s39_s27), %s1463_s24 }
   0xb   : > { %1759 = sst [smem:[#allocation6_spill]] %s1772_s26  ;;  %p542_p3 = pnand %p1261_p1, %p541_p2 }
   0xc   : > { %p41_p4 = scmp.ge.s32.totalorder %s1774_s27, 2  ;;  %p629_p5 = scmp.lt.s32.totalorder (!%p542_p3), %s1451_s21, 3 }
   0xd   : > { %545 = sbr.rel (%p542_p3) target bundleno = 1661 (0x67d), region = 80  ;;  %p625_p6 = scmp.lt.s32.totalorder (!%p542_p3), %s1455_s22, 1 }
   0xe   : > { %s1776_s27 = smov (%p41_p4, %s1774_s27), 0  ;;  %s1761_s13 = sld [smem:[#allocation8_spill]] (!%p542_p3) }
   0xf   : > { %1760 = sst [smem:[#allocation7_spill]] %s1776_s27  ;;  %p1303_p7 = scmp.ne.s32.totalorder (!%p542_p3), %s1451_s21, 0 }
  0x12   : > { %s1590_s28 = scalar_select %p629_p5, %s1451_s21, 3  ;;  %vm692_vm0 = vcmask 261120   ;;  %vm777_vm1 = vcmask 64512   ;;  %v798_v19 = vlaneseq  ;;  %vm821_vm3 = vcmask 1043456  }
  0x13   : > { %s1778_s22 = smov (!%p625_p6, %s1455_s22), 1 }
  0x14   : > { %s1595_s29 = sshll.u32 %s1590_s28, 4  ;;  %s636_s17 = scalar_lea.vmem %s1733_s2, %s1590_s28  ;;  %v799_v20 = vshrl.u32 %v798_v19, 7  ;;  %v801_v21 = vand.u32 127, %v798_v19 }
  0x15   : > { %s633_s20 = scalar_lea.vmem %s1732_s1, %s1595_s29  ;;  %s641_s24 = scalar_lea.vmem %s1734_s3, %s1595_s29  ;;  %v1409_v9 = vld [vmem:[%s636_s17] ss:$0 sm:$0xff] }
  0x16   : > { %v1352_v0 = vld [vmem:[%s633_s20 + $0x8] sm:$0xff]  ;;  %s1262_s23 = sshll.u32 %s1778_s22, 3  ;;  %v1351_v2 = vld [vmem:[%s633_s20] sm:$0xff]  ;;  %s644_s18 = scalar_lea.vmem %s1735_s4, %s1590_s28  ;;  %vm802_vm2 = vcmp.le.s32.totalorder %v801_v21, %v799_v20 }
  0x17   : > { %v1354_v1 = vld [vmem:[%s641_s24 + $0x8] sm:$0xff]  ;;  %s628_s10 = scalar_lea.vmem %s1761_s13, %s1262_s23  ;;  %s1616_s0 = scalar_lea.vmem %s1746_s15, %s1262_s23  ;;  %702 = vmatpush.bf16.msra.mxu0 %v1352_v0  ;;  %v1353_v3 = vld [vmem:[%s641_s24] sm:$0xff] }
  0x18   : > { %735 = vmatpush.bf16.msra.mxu1 %v1354_v1  ;;  %v1618_v4 = vld [vmem:[%s628_s10] sm:$0xff]  ;;  %s649_s13 = scalar_lea.vmem %s1736_s5, %s1595_s29  ;;  %s652_s24 = scalar_lea.vmem %s1737_s6, %s1590_s28 }
  0x19   : > { %v671_v5 = vpack.c.bf16 %v1618_v4, %v1618_v4  ;;  %v1410_v6 = vld [vmem:[%s644_s18] ss:$0 sm:$0xff]  ;;  %v1356_v17 = vld [vmem:[%s649_s13 + $0x8] sm:$0xff]  ;;  %s1269_s25 = sshll.u32 %s1590_s28, 2  ;;  %s1271_s20 = sshll.u32 %s1778_s22, 2 }
  0x1a   : > { %768 = vmatpush.bf16.msra.mxu2 %v1356_v17  ;;  %v1355_v18 = vld [vmem:[%s649_s13] sm:$0xff]  ;;  %s656_s19 = scalar_lea.vmem %s1738_s7, %s1269_s25  ;;  %s666_s30 = sadd.s32 %s1271_s20, %s1590_s28 }
  0x1b   : > { %703 = vmatpush.bf16.msra.mxu0 %v1351_v2  ;;  %v1411_v27 = vld [vmem:[%s652_s24] ss:$0 sm:$0xff]  ;;  %s1272_s26 = sshll.u32 %s666_s30, 3 }
  0x1c   : > { %736 = vmatpush.bf16.msra.mxu1 %v1353_v3  ;;  %v839_v38 = vld [vmem:[%s656_s19] sm:$0xf]  ;;  %s668_s9 = scalar_lea.vmem %s1747_s16, %s1272_s26 }
  0x1d   : > { %v844_v39 = vsel %vm821_vm3, %v839_v38, 0 }
  0x1e   : > { %1281 = vmatmul.msk.bf16.vlgmr.msra.gmra.mxu0 %vm692_vm0, %v671_v5  ;;  %769 = vmatpush.bf16.msra.mxu2 %v1355_v18 }
  0x1f   : > { %1290 = vmatmul.msk.bf16.vlgmr.msra.gmra.mxu1 %vm692_vm0, %v671_v5 }
  0x20   : > { %853 = vmatpush.bf16.msrb.mxu1 %v844_v39 }
  0x21   : > { %1299 = vmatmul.msk.bf16.vlgmr.msra.gmra.mxu2 %vm692_vm0, %v671_v5 }
  0x9b   : > { %v705_v7 = vpop.f32.mrf.mxu0 }
  0x9c   : > { %v738_v8 = vpop.f32.mrf.mxu1  ;;  %v706_v12 = vadd.f32 %v1409_v9, %v705_v7 }
  0x9d   : > { %v739_v10 = vadd.f32 %v1410_v6, %v738_v8 }
  0x9e   : > { %v775_v16 = vpack.c.bf16 %v706_v12, %v706_v12 }
  0x9f   : > { %v776_v11 = vpack.c.bf16 %v739_v10, %v739_v10 }
  0xa1   : > { %v782_v13 = vsel %vm777_vm1, %v776_v11, 0 }
  0xa2   : > { %791 = vmatpush.bf16.xpose.msra.mxu3 %v782_v13 }
  0xa3   : > { %v707_v14 = vpop.f32.mrf.mxu0 }
  0xa4   : > { %v740_v15 = vpop.f32.mrf.mxu1  ;;  %v771_v28 = vpop.f32.mrf.mxu2 }
  0xa5   : > { %v772_v29 = vadd.f32 %v1411_v27, %v771_v28 }
  0xa7   : > { %v817_v30 = vpack.c.bf16 %v772_v29, %v772_v29 }
  0xa9   : > { %1300 = vmatmul.msk.bf16.vlgmr.msra.gmra.mxu3 %vm777_vm1, %v775_v16  ;;  %v823_v33 = vsel %vm821_vm3, %v817_v30, 0 }
  0xaa   : > { %832 = vmatpush.bf16.msrb.mxu0 %v823_v33 }
  0xac   : > { %v773_v35 = vpop.f32.mrf.mxu2 }
 0x12c   : > { %v793_v22 = vpop.f32.mrf.mxu3 }
 0x12d   : > { %v797_v23 = vmul.f32 0.35355338, %v793_v22 }
 0x12f   : > { %v803_v24 = vsel %vm802_vm2, %v797_v23, -1e+20 }
 0x130   : > { %v804_v25 = vsel %vm777_vm1, %v803_v24, -inf }
 0x131   : > { %805 = vmax.xlane.f32.xlu0 %v804_v25 }
 0x134   : > { %v795_v26 = vpop.f32.mrf.mxu3 }
 0x1a4   : > { %v806_v31 = vpop.xlane.xlu0 %805 }
 0x1a5   : > { %v807_v32 = vsub.f32 %v803_v24, %v806_v31 }
 0x1a7   : > { %v808_v34 = vmul.f32 1.442695, %v807_v32 }
 0x1a9   : > { %1412 = vpow2.f32 %v808_v34 }
 0x1af   : > { %v1413_v36 = vpop.eup %1412 }
 0x1b0   : > { %v810_v37 = vsel %vm777_vm1, %v1413_v36, 0.0 }
 0x1b1   : > { %811 = vadd.xlane.f32.xlu0 %v810_v37 }
 0x224   : > { %v812_v40 = vpop.xlane.xlu0 %811 }
 0x225   : > { %1414 = vrcp.f32 %v812_v40 }
 0x22b   : > { %v1415_v41 = vpop.eup %1414 }
 0x22c   : > { %v814_v42 = vmul.f32 %v1415_v41, %v1413_v36 }
 0x22e   : > { %815 = vst.msk [vmem:[%s668_s9] sm:$0xff] %vm777_vm1, %v814_v42  ;;  %v816_v43 = vpack.c.bf16 %v814_v42, %v814_v42 }
 0x230   : > { %1301 = vmatmul.msk.bf16.vlgmr.msrb.gmra.mxu0 %vm777_vm1, %v816_v43 }
 0x2ad   : > { %v834_v44 = vpop.f32.mrf.mxu0 }
 0x2ae   : > { %v838_v45 = vpack.c.bf16 %v834_v44, %v834_v44 }
 0x2b0   : > { %1302 = vmatmul.msk.bf16.vlgmr.msrb.gmra.mxu1 %vm777_vm1, %v838_v45 }
 0x2b5   : > { %v836_v46 = vpop.f32.mrf.mxu0 }
 0x32d   : > { %v855_v47 = vpop.f32.mrf.mxu1 }
 0x331   : > { %862 = sbr.rel (%p1303_p7) target bundleno = 824 (0x338), region = 84 }
 0x335   : > { %v857_v48 = vpop.f32.mrf.mxu1 }
 0x336   : > { %v1469_v49 = vmov 0.0  }
 0x337   : > { %863 = vst.msk [vmem:[#allocation2] sm:$0xff] %vm692_vm0, %v1469_v49 }
 0x338 PF: > { %p1304_p8 = scmp.ne.s32.totalorder %s1451_s21, 3 }
 0x339   : > { %s1762_s20 = sld [smem:[#allocation9_spill]] (!%p1304_p8) }
 0x33a   : > { %s1763_s27 = sld [smem:[#allocation10_spill]] (!%p1304_p8) }
 0x33d   : > { %870 = sbr.rel (%p1304_p8) target bundleno = 1661 (0x67d), region = 88 }
 0x33e   : > { %v864_v50 = vld [vmem:[#allocation2] sm:$0xff] }
 0x33f   : > { %v865_v51 = vadd.f32 %v864_v50, %v855_v47 }
 0x341   : > { %866 = vst.msk [vmem:[#allocation2] sm:$0xff] %vm692_vm0, %v865_v51 }
 0x342   : > { %v1416_v53 = vld [vmem:[%s1739_s8] ss:$0 sm:$0xff]  ;;  %v1470_v57 = vmov 32.0   ;;  %v1358_v5 = vld [vmem:[%s1742_s11 + $0x8] sm:$0xff]  ;;  %v1366_v7 = vld [vmem:[%s1743_s12 + $0x38] sm:$0xff] }
 0x343   : > { %1421 = vrcp.f32 %v1470_v57  ;;  %943 = vmatpush.bf16.msra.mxu0 %v1358_v5  ;;  %v1357_v6 = vld [vmem:[%s1742_s11] sm:$0xff]  ;;  %1024 = vmatpush.bf16.msra.mxu1 %v1366_v7  ;;  %v1365_v10 = vld [vmem:[%s1743_s12 + $0x30] sm:$0xff]  ;;  %v1364_v25 = vld [vmem:[%s1743_s12 + $0x28] sm:$0xff] }
 0x344   : > { %v1417_v18 = vld [vmem:[%s1762_s20] ss:$0 sm:$0xff]  ;;  %v1362_v27 = vld [vmem:[%s1743_s12 + $0x18] sm:$0xff]  ;;  %v1361_v28 = vld [vmem:[%s1743_s12 + $0x10] sm:$0xff]  ;;  %s1764_s20 = sld [smem:[#allocation11_spill]] }
 0x345   : > { %v1418_v21 = vld [vmem:[%s1763_s27] ss:$0 sm:$0xff]  ;;  %v1360_v29 = vld [vmem:[%s1743_s12 + $0x8] sm:$0xff]  ;;  %s1765_s27 = sld [smem:[#allocation12_spill]] }
 0x346   : > { %v1363_v26 = vld [vmem:[%s1743_s12 + $0x20] sm:$0xff] }
 0x347   : > { %944 = vmatpush.bf16.msra.mxu0 %v1357_v6  ;;  %1025 = vmatpush.bf16.msra.mxu1 %v1365_v10  ;;  %v1359_v30 = vld [vmem:[%s1743_s12] sm:$0xff] }
 0x348   : > { %v871_v52 = vld [vmem:[#allocation2] sm:$0xff] }
 0x349   : > { %v876_v54 = vadd.f32 %v1416_v53, %v871_v52  ;;  %v1422_v58 = vpop.eup %1421 }
 0x34a   : > { %v884_v59 = vmul.f32 32.0, %v1422_v58  ;;  %vm888_vm4 = vweird.f32 %v1422_v58 }
 0x34b   : > { %v877_v55 = vadd.f32 %v876_v54, %v1618_v4  ;;  %1026 = vmatpush.bf16.msra.mxu1 %v1364_v25 }
 0x34c   : > { %v885_v60 = vsub.f32 1.0, %v884_v59 }
 0x34d   : > { %v880_v56 = vsel %vm692_vm0, %v877_v55, 0.0 }
 0x34e   : > { %881 = vadd.xlane.f32.xlu0 %v880_v56  ;;  %v886_v61 = vmul.f32 %v1422_v58, %v885_v60 }
 0x34f   : > { %1027 = vmatpush.bf16.msra.mxu1 %v1363_v26 }
 0x350   : > { %v887_v62 = vadd.f32 %v1422_v58, %v886_v61  ;;  %v1419_v61 = vld [vmem:[%s1764_s20] ss:$0 sm:$0xff] }
 0x352   : > { %v1662_v63 = vsel %vm888_vm4, %v1422_v58, %v887_v62 }
 0x353   : > { %1028 = vmatpush.bf16.msra.mxu1 %v1362_v27 }
 0x357   : > { %1029 = vmatpush.bf16.msra.mxu1 %v1361_v28 }
 0x35b   : > { %1030 = vmatpush.bf16.msra.mxu1 %v1360_v29 }
 0x35f   : > { %1031 = vmatpush.bf16.msra.mxu1 %v1359_v30 }
 0x3c1   : > { %v882_v0 = vpop.xlane.xlu0 %881 }
 0x3c2   : > { %v890_v1 = vmul.f32 %v1662_v63, %v882_v0 }
 0x3c4   : > { %v891_v2 = vsub.f32 %v877_v55, %v890_v1 }
 0x3c6   : > { %v892_v3 = vmul.f32 %v891_v2, %v891_v2 }
 0x3c8   : > { %v893_v4 = vsel %vm692_vm0, %v892_v3, 0.0 }
 0x3c9   : > { %894 = vadd.xlane.f32.xlu0 %v893_v4 }
 0x43c   : > { %v895_v8 = vpop.xlane.xlu0 %894 }
 0x43d   : > { %v896_v9 = vmul.f32 %v895_v8, %v1662_v63 }
 0x43f   : > { %v897_v11 = vadd.f32 1e-05, %v896_v9 }
 0x441   : > { %1423 = vrsqrt.f32 %v897_v11  ;;  %vm904_vm6 = vweird.f32 %v897_v11 }
 0x447   : > { %v1424_v12 = vpop.eup %1423 }
 0x448   : > { %v899_v13 = vmul.f32 %v1424_v12, %v897_v11  ;;  %vm905_vm5 = vweird.f32 %v1424_v12 }
 0x449   : > { %vm906_vm7 = vmor %vm904_vm6, %vm905_vm5 }
 0x44a   : > { %v900_v14 = vmul.f32 %v1424_v12, %v899_v13 }
 0x44c   : > { %v901_v15 = vmul.f32 0.5, %v900_v14 }
 0x44e   : > { %v902_v16 = vsub.f32 1.5, %v901_v15 }
 0x450   : > { %v903_v17 = vmul.f32 %v1424_v12, %v902_v16 }
 0x452   : > { %v907_v19 = vsel %vm906_vm7, %v1424_v12, %v903_v17 }
 0x453   : > { %v908_v20 = vmul.f32 %v907_v19, %v891_v2 }
 0x455   : > { %v912_v22 = vmul.f32 %v1417_v18, %v908_v20 }
 0x457   : > { %v916_v23 = vadd.f32 %v1418_v21, %v912_v22 }
 0x459   : > { %v917_v24 = vpack.c.bf16 %v916_v23, %v916_v23 }
 0x45b   : > { %1313 = vmatmul.msk.bf16.vlgmr.msra.gmra.mxu0 %vm692_vm0, %v917_v24 }
 0x4d8   : > { %v946_v31 = vpop.f32.mrf.mxu0 }
 0x4d9   : > { %v951_v32 = vmul.f32 0.044715, %v946_v31  ;;  %v950_v39 = vmul.f32 0.5, %v946_v31 }
 0x4db   : > { %v952_v33 = vmul.f32 %v951_v32, %v946_v31 }
 0x4dd   : > { %v953_v34 = vmul.f32 %v952_v33, %v946_v31 }
 0x4df   : > { %v954_v35 = vadd.f32 %v953_v34, %v946_v31 }
 0x4e0   : > { %v948_v36 = vpop.f32.mrf.mxu0 }
 0x4e1   : > { %v955_v37 = vmul.f32 0.7978846, %v954_v35 }
 0x4e3   : > { %1425 = vtanh.f32 %v955_v37 }
 0x4e9   : > { %v1426_v38 = vpop.eup %1425 }
 0x4ea   : > { %v957_v40 = vadd.f32 1.0, %v1426_v38 }
 0x4ec   : > { %v958_v41 = vmul.f32 %v957_v40, %v950_v39 }
 0x4ee   : > { %v959_v42 = vpack.c.bf16 %v958_v41, %v958_v41 }
 0x4f0   : > { %1032 = vmatmul.bf16.vlgmr.msra.gmra.mxu1 %v959_v42 }
 0x56d   : > { %v1033_v43 = vpop.f32.mrf.mxu1 }
 0x56e   : > { %v1037_v44 = vadd.f32 %v1033_v43, %v916_v23 }
 0x570   : > { %v1040_v45 = vsel %vm692_vm0, %v1037_v44, 0.0 }
 0x571   : > { %1041 = vadd.xlane.f32.xlu1 %v1040_v45 }
 0x575   : > { %v1035_v46 = vpop.f32.mrf.mxu1 }
 0x5e4   : > { %v1042_v47 = vpop.xlane.xlu1 %1041 }
 0x5e5   : > { %v1043_v48 = vmul.f32 %v1042_v47, %v1662_v63 }
 0x5e7   : > { %v1044_v49 = vsub.f32 %v1037_v44, %v1043_v48 }
 0x5e9   : > { %v1045_v50 = vmul.f32 %v1044_v49, %v1044_v49 }
 0x5eb   : > { %v1046_v51 = vsel %vm692_vm0, %v1045_v50, 0.0 }
 0x5ec   : > { %1047 = vadd.xlane.f32.xlu1 %v1046_v51 }
 0x65f   : > { %v1048_v52 = vpop.xlane.xlu1 %1047 }
 0x660   : > { %v1049_v53 = vmul.f32 %v1048_v52, %v1662_v63  ;;  %v1420_v63 = vld [vmem:[%s1765_s27] ss:$0 sm:$0xff] }
 0x662   : > { %v1050_v54 = vadd.f32 1e-05, %v1049_v53 }
 0x664   : > { %1427 = vrsqrt.f32 %v1050_v54  ;;  %vm1057_vm9 = vweird.f32 %v1050_v54 }
 0x66a   : > { %v1428_v55 = vpop.eup %1427 }
 0x66b   : > { %v1052_v56 = vmul.f32 %v1428_v55, %v1050_v54  ;;  %vm1058_vm8 = vweird.f32 %v1428_v55 }
 0x66c   : > { %vm1059_vm10 = vmor %vm1057_vm9, %vm1058_vm8 }
 0x66d   : > { %v1053_v57 = vmul.f32 %v1428_v55, %v1052_v56 }
 0x66f   : > { %v1054_v58 = vmul.f32 0.5, %v1053_v57 }
 0x671   : > { %v1055_v59 = vsub.f32 1.5, %v1054_v58 }
 0x673   : > { %v1056_v60 = vmul.f32 %v1428_v55, %v1055_v59 }
 0x675   : > { %v1060_v62 = vsel %vm1059_vm10, %v1428_v55, %v1056_v60 }
 0x676   : > { %v1061_v0 = vmul.f32 %v1060_v62, %v1044_v49 }
 0x678   : > { %v1065_v1 = vmul.f32 %v1419_v61, %v1061_v0 }
 0x67a   : > { %v1069_v2 = vadd.f32 %v1420_v63, %v1065_v1 }
 0x67c   : > { %1070 = vst.msk [vmem:[%s1616_s0] sm:$0xff] %vm692_vm0, %v1069_v2 }
 0x67d PF: > { %s1766_s18 = sld [smem:[#allocation5_spill]] }
 0x67e   : > { %s1767_s21 = sld [smem:[#allocation3_spill]] }
 0x67f   : > { %s1768_s22 = sld [smem:[#allocation4_spill]] }
 0x680   : > { %s1769_s23 = sld [smem:[#allocation6_spill]] }
 0x681   : > { %s1770_s24 = sld [smem:[#allocation7_spill]] }
 0x683   : > { %s27_s25 = sadd.s32 1, %s1766_s18  }
 0x684   : > { %p24_p9 = scmp.ge.s32.totalorder %s27_s25, 10  }
 0x686   :  { %26 = sbr.rel (!%p24_p9) target bundleno = 6 (0x6), region = 151 }

</bundles_post_ra>
